<compile_context>
chip_gen: v6e
topology: v6e:2x2x1
jax: 0.10.0
libtpu: 0.0.40
codegen_flags: <defaults>
</compile_context>

<pallas_src>
import functools

import jax
import jax.numpy as jnp
from jax.experimental import pallas as pl
from jax.experimental.pallas import tpu as pltpu


def _round_up(x, m):
    return ((x + m - 1) // m) * m


def _gce_kernel(logits_ref, targets_ref, ws_ref, out_ref, *,
                q: float, total_n: int, tn: int, tiles_per_group: int):
    # logits_ref: [TN, C] (f32 or bf16), targets_ref: [TN, 1] i32,
    # ws_ref: [TN, 1] f32, out_ref: [1, 8, 128] f32 (per-group partial sum,
    # resident across the inner "arbitrary" axis).
    g = pl.program_id(0)
    i = pl.program_id(1)

    @pl.when(i == 0)
    def _init():
        out_ref[...] = jnp.zeros_like(out_ref)

    logits = logits_ref[...].astype(jnp.float32)   # upcast in-kernel (bf16 ok)
    n_rows, c = logits.shape

    # one-hot mask for the gather: probs.gather(1, targets)
    col_ids = jax.lax.broadcasted_iota(jnp.int32, (n_rows, c), 1)
    onehot = (col_ids == targets_ref[...]).astype(jnp.float32)

    # numerically-stable log-softmax
    row_max = jnp.max(logits, axis=1, keepdims=True)
    shifted = logits - row_max
    lse = jnp.log(jnp.sum(jnp.exp(shifted), axis=1, keepdims=True))     # [TN,1]

    # log prob of the target class, per sample
    target_shifted = jnp.sum(shifted * onehot, axis=1, keepdims=True)   # [TN,1]
    log_p_t = target_shifted - lse                                      # [TN,1]

    # target_probs ** q  ==  exp(q * log(target_probs))   (detached weight)
    p_t_pow_q = jnp.exp(q * log_p_t)
    loss_weight = (1.0 - p_t_pow_q) / q                                 # [TN,1]

    # F.cross_entropy(..., reduction='none') == -log_softmax[target]
    ce = -log_p_t                                                       # [TN,1]
    loss = ce * loss_weight * ws_ref[...].astype(jnp.float32)           # [TN,1]

    # mask rows beyond the true batch size (partial / phantom tiles)
    tile_idx = g * tiles_per_group + i
    row0 = tile_idx * tn
    row_ids = jax.lax.broadcasted_iota(jnp.int32, (n_rows, 1), 0) + row0
    loss = jnp.where(row_ids < total_n, loss, 0.0)

    # accumulate into the resident per-group output block (lane-dense vreg)
    out_ref[...] = out_ref[...] + jnp.sum(loss)


def generalized_ce_loss(logits, targets, ws=None, q=0.7):
    """Matches GeneralizedCELoss.forward semantics.

    logits: [N, C] float (f32 or bf16)
    targets: [N] int class indices, or [N, C] one-hot / soft labels (argmax'd)
    ws: optional [N] per-sample weights
    """
    logits = jnp.asarray(logits)
    if logits.dtype not in (jnp.dtype(jnp.float32), jnp.dtype(jnp.bfloat16)):
        logits = logits.astype(jnp.float32)
    n, c = logits.shape

    targets = jnp.asarray(targets)
    if targets.ndim == 2:
        targets = jnp.argmax(targets, axis=1)
    targets = targets.astype(jnp.int32).reshape(n, 1)

    if ws is None:
        ws_arr = jnp.ones((n, 1), jnp.float32)
    else:
        ws_arr = jnp.asarray(ws, jnp.float32).reshape(n, 1)

    itemsize = int(jnp.dtype(logits.dtype).itemsize)

    # Row tile: largest of <=1024 rows that keeps one logits tile under ~4 MiB
    # (double-buffered this stays well inside v7x's 64 MiB VMEM too).
    tn = max(8, min(1024, (4 * 1024 * 1024) // max(c * itemsize, 1)))
    tn -= tn % 8
    tn = max(tn, 8)
    tn = min(tn, _round_up(n, 8))

    num_tiles = pl.cdiv(n, tn)
    ng = 2 if num_tiles >= 2 else 1           # megacore split (2 TCs on v7x)
    tpg = pl.cdiv(num_tiles, ng)              # row tiles per group

    def row_block(g, i):
        # clamp phantom tiles (ng * tpg may exceed num_tiles) so the DMA never
        # goes out of bounds; masked rows contribute zero anyway.
        t = jnp.minimum(g * tpg + i, num_tiles - 1)
        return (t, 0)

    kernel = functools.partial(
        _gce_kernel, q=float(q), total_n=n, tn=tn, tiles_per_group=tpg)

    # padded-VMEM working-set estimate (lane dim pads to 128) for the limit
    lane_pad = lambda x: _round_up(x, 128)
    tile_bytes = tn * lane_pad(c) * itemsize + 2 * tn * lane_pad(1) * 4
    vmem_limit = int(min(max(3 * tile_bytes + (4 << 20), 16 << 20), 64 << 20))

    out = pl.pallas_call(
        kernel,
        out_shape=jax.ShapeDtypeStruct((ng, 8, 128), jnp.float32),
        grid=(ng, tpg),
        in_specs=[
            pl.BlockSpec((tn, c), row_block),
            pl.BlockSpec((tn, 1), row_block),
            pl.BlockSpec((tn, 1), row_block),
        ],
        out_specs=pl.BlockSpec((1, 8, 128), lambda g, i: (g, 0, 0)),
        compiler_params=pltpu.CompilerParams(
            dimension_semantics=("parallel", "arbitrary"),
            vmem_limit_bytes=vmem_limit,
        ),
        cost_estimate=pl.CostEstimate(
            flops=int(10 * n * c),
            transcendentals=int(n * (c + 1)),
            bytes_accessed=int(n * c * itemsize + 8 * n),
        ),
    )(logits, targets, ws_arr)

    # every element of a group's (8,128) block carries that group's sum
    return jnp.sum(out[:, 0, 0]) / jnp.float32(n)


def _reference(logits, targets, ws=None, q=0.7):
    if targets.ndim == 2:
        targets = jnp.argmax(targets, axis=1)
    targets = targets.astype(jnp.int32)
    logp = jax.nn.log_softmax(logits.astype(jnp.float32), axis=1)
    log_p_t = jnp.take_along_axis(logp, targets[:, None], axis=1)[:, 0]
    p_t = jnp.exp(log_p_t)
    loss_weight = (1.0 - p_t ** q) / q
    loss = -log_p_t * loss_weight
    if ws is not None:
        loss = loss * ws
    return jnp.mean(loss)


if __name__ == "__main__":
    key = jax.random.PRNGKey(0)
    k1, k2, k3, k4, k5, k6 = jax.random.split(key, 6)

    # case 1/2: small shapes (single tile)
    N, C = 8, 16
    logits = jax.random.normal(k1, (N, C), jnp.float32) * 2.0
    targets = jax.random.randint(k2, (N,), 0, C, jnp.int32)
    ws = jax.random.uniform(k3, (N,), jnp.float32) + 0.5

    out1 = jax.block_until_ready(generalized_ce_loss(logits, targets))
    ref1 = _reference(logits, targets)
    assert jnp.allclose(out1, ref1, atol=1e-5, rtol=1e-4), (out1, ref1)

    onehot_targets = jax.nn.one_hot(targets, C, dtype=jnp.float32)
    out2 = jax.block_until_ready(
        generalized_ce_loss(logits, onehot_targets, ws=ws))
    ref2 = _reference(logits, onehot_targets, ws=ws)
    assert jnp.allclose(out2, ref2, atol=1e-5, rtol=1e-4), (out2, ref2)

    # case 3: multi-tile path with a partial last tile + 2-group (megacore)
    N2, C2 = 2000, 16
    logits2 = jax.random.normal(k4, (N2, C2), jnp.float32) * 2.0
    targets2 = jax.random.randint(k5, (N2,), 0, C2, jnp.int32)
    ws2 = jax.random.uniform(k6, (N2,), jnp.float32) + 0.5
    out3 = jax.block_until_ready(
        generalized_ce_loss(logits2, targets2, ws=ws2))
    ref3 = _reference(logits2, targets2, ws=ws2)
    assert jnp.allclose(out3, ref3, atol=1e-5, rtol=1e-4), (out3, ref3)

    print("KERNEL_OK")
</pallas_src>

<mosaic_0001>
module attributes {stable_mosaic.version = 11 : i64} {
  func.func @_gce_kernel(%arg0: i32, %arg1: i32, %arg2: memref<8x16xf32, #tpu.memory_space<vmem>>, %arg3: memref<8x1xi32, #tpu.memory_space<vmem>>, %arg4: memref<8x1xf32, #tpu.memory_space<vmem>>, %arg5: memref<1x8x128xf32, #tpu.memory_space<vmem>>) attributes {dimension_semantics = [#tpu.dimension_semantics<parallel>, #tpu.dimension_semantics<arbitrary>], iteration_bounds = array<i64: 1, 1>, scalar_prefetch = 0 : i64, scratch_operands = 0 : i64, tpu.core_type = #tpu.core_type<tc>, window_params = [{transform_indices = @transform_0, window_bounds = array<i64: 8, 16>}, {transform_indices = @transform_1, window_bounds = array<i64: 8, 1>}, {transform_indices = @transform_2, window_bounds = array<i64: 8, 1>}, {transform_indices = @transform_3, window_bounds = array<i64: 1, 8, 128>}]} {
    %c0_i32 = arith.constant 0 : i32
    %0 = arith.cmpi eq, %arg1, %c0_i32 : i32
    %1 = arith.extui %0 : i1 to i32
    %c0_i32_0 = arith.constant 0 : i32
    %2 = arith.cmpi ne, %1, %c0_i32_0 : i32
    scf.if %2 {
      %cst_21 = arith.constant 0.000000e+00 : f32
      %52 = vector.broadcast %cst_21 : f32 to vector<1x8x128xf32>
      %c0_22 = arith.constant 0 : index
      %c0_23 = arith.constant 0 : index
      %c0_24 = arith.constant 0 : index
      %53 = vector.load %arg5[%c0_22, %c0_23, %c0_24] : memref<1x8x128xf32, #tpu.memory_space<vmem>>, vector<1x8x128xf32>
      tpu.vector_store %arg5[%c0_22, %c0_23, %c0_24], %52 {strides = array<i32>} : memref<1x8x128xf32, #tpu.memory_space<vmem>>, vector<1x8x128xf32>,
    } else {
    }
    %c0 = arith.constant 0 : index
    %c0_1 = arith.constant 0 : index
    %3 = vector.load %arg2[%c0, %c0_1] : memref<8x16xf32, #tpu.memory_space<vmem>>, vector<8x16xf32>
    %4 = tpu.iota {dimensions = array<i32: 1>} : vector<8x16xi32>
    %c0_2 = arith.constant 0 : index
    %c0_3 = arith.constant 0 : index
    %5 = vector.load %arg3[%c0_2, %c0_3] : memref<8x1xi32, #tpu.memory_space<vmem>>, vector<8x1xi32>
    %6 = vector.broadcast %5 : vector<8x1xi32> to vector<8x16xi32>
    %7 = arith.cmpi eq, %4, %6 : vector<8x16xi32>
    %8 = arith.extui %7 : vector<8x16xi1> to vector<8x16xi32>
    %9 = arith.sitofp %8 : vector<8x16xi32> to vector<8x16xf32>
    %cst = arith.constant dense<0xFF800000> : vector<8xf32>
    %10 = vector.multi_reduction <maximumf>, %3, %cst [1] : vector<8x16xf32> to vector<8xf32>
    %11 = vector.shape_cast %10 : vector<8xf32> to vector<8x1xf32>
    %12 = vector.broadcast %11 : vector<8x1xf32> to vector<8x16xf32>
    %13 = arith.subf %3, %12 : vector<8x16xf32>
    %14 = math.exp %13 : vector<8x16xf32>
    %cst_4 = arith.constant dense<0.000000e+00> : vector<8xf32>
    %15 = vector.multi_reduction <add>, %14, %cst_4 [1] : vector<8x16xf32> to vector<8xf32>
    %16 = vector.shape_cast %15 : vector<8xf32> to vector<8x1xf32>
    %17 = math.log %16 : vector<8x1xf32>
    %18 = arith.mulf %13, %9 : vector<8x16xf32>
    %cst_5 = arith.constant dense<0.000000e+00> : vector<8xf32>
    %19 = vector.multi_reduction <add>, %18, %cst_5 [1] : vector<8x16xf32> to vector<8xf32>
    %20 = vector.shape_cast %19 : vector<8xf32> to vector<8x1xf32>
    %21 = arith.subf %20, %17 : vector<8x1xf32>
    %cst_6 = arith.constant 0.699999988 : f32
    %22 = vector.broadcast %cst_6 : f32 to vector<8x1xf32>
    %23 = arith.mulf %22, %21 : vector<8x1xf32>
    %24 = math.exp %23 : vector<8x1xf32>
    %cst_7 = arith.constant 1.000000e+00 : f32
    %25 = vector.broadcast %cst_7 : f32 to vector<8x1xf32>
    %26 = arith.subf %25, %24 : vector<8x1xf32>
    %cst_8 = arith.constant 0.699999988 : f32
    %27 = vector.broadcast %cst_8 : f32 to vector<8x1xf32>
    %28 = arith.divf %26, %27 : vector<8x1xf32>
    %cst_9 = arith.constant 0.000000e+00 : f32
    %29 = vector.broadcast %cst_9 : f32 to vector<8x1xf32>
    %30 = arith.subf %29, %21 : vector<8x1xf32>
    %31 = arith.mulf %30, %28 : vector<8x1xf32>
    %c0_10 = arith.constant 0 : index
    %c0_11 = arith.constant 0 : index
    %32 = vector.load %arg4[%c0_10, %c0_11] : memref<8x1xf32, #tpu.memory_space<vmem>>, vector<8x1xf32>
    %33 = arith.mulf %31, %32 : vector<8x1xf32>
    %c1_i32 = arith.constant 1 : i32
    %34 = arith.muli %arg0, %c1_i32 : i32
    %35 = arith.addi %34, %arg1 : i32
    %c8_i32 = arith.constant 8 : i32
    %36 = arith.muli %35, %c8_i32 : i32
    %37 = tpu.iota {dimensions = array<i32: 0>} : vector<8x1xi32>
    %38 = vector.broadcast %36 : i32 to vector<8x1xi32>
    %39 = arith.addi %37, %38 : vector<8x1xi32>
    %c8_i32_12 = arith.constant 8 : i32
    %40 = vector.broadcast %c8_i32_12 : i32 to vector<8x1xi32>
    %41 = arith.cmpi slt, %39, %40 : vector<8x1xi32>
    %cst_13 = arith.constant 0.000000e+00 : f32
    %42 = vector.broadcast %cst_13 : f32 to vector<8x1xf32>
    %43 = arith.select %41, %33, %42 : vector<8x1xi1>, vector<8x1xf32>
    %c0_14 = arith.constant 0 : index
    %c0_15 = arith.constant 0 : index
    %c0_16 = arith.constant 0 : index
    %44 = vector.load %arg5[%c0_14, %c0_15, %c0_16] : memref<1x8x128xf32, #tpu.memory_space<vmem>>, vector<1x8x128xf32>
    %45 = vector.shape_cast %43 : vector<8x1xf32> to vector<1x8x1xf32>
    %cst_17 = arith.constant dense<0.000000e+00> : vector<1xf32>
    %46 = vector.multi_reduction <add>, %45, %cst_17 [1, 2] : vector<1x8x1xf32> to vector<1xf32>
    %47 = vector.shape_cast %46 : vector<1xf32> to vector<1x1x1xf32>
    %48 = vector.extract %47[0, 0, 0] : f32 from vector<1x1x1xf32>
    %49 = vector.broadcast %48 : f32 to vector<1x8x128xf32>
    %50 = arith.addf %44, %49 : vector<1x8x128xf32>
    %c0_18 = arith.constant 0 : index
    %c0_19 = arith.constant 0 : index
    %c0_20 = arith.constant 0 : index
    %51 = vector.load %arg5[%c0_18, %c0_19, %c0_20] : memref<1x8x128xf32, #tpu.memory_space<vmem>>, vector<1x8x128xf32>
    tpu.vector_store %arg5[%c0_18, %c0_19, %c0_20], %50 {strides = array<i32>} : memref<1x8x128xf32, #tpu.memory_space<vmem>>, vector<1x8x128xf32>,
    return
  }
  func.func @transform_0(%arg0: i32, %arg1: i32) -> (i32, i32) {
    %c1_i32 = arith.constant 1 : i32
    %0 = arith.muli %arg0, %c1_i32 : i32
    %1 = arith.addi %0, %arg1 : i32
    %c0_i32 = arith.constant 0 : i32
    %2 = arith.minsi %1, %c0_i32 : i32
    %c0_i32_0 = arith.constant 0 : i32
    %c0_i32_1 = arith.constant 0 : i32
    return %2, %c0_i32_0 : i32, i32
  }
  func.func @transform_1(%arg0: i32, %arg1: i32) -> (i32, i32) {
    %c1_i32 = arith.constant 1 : i32
    %0 = arith.muli %arg0, %c1_i32 : i32
    %1 = arith.addi %0, %arg1 : i32
    %c0_i32 = arith.constant 0 : i32
    %2 = arith.minsi %1, %c0_i32 : i32
    %c0_i32_0 = arith.constant 0 : i32
    %c0_i32_1 = arith.constant 0 : i32
    return %2, %c0_i32_0 : i32, i32
  }
  func.func @transform_2(%arg0: i32, %arg1: i32) -> (i32, i32) {
    %c1_i32 = arith.constant 1 : i32
    %0 = arith.muli %arg0, %c1_i32 : i32
    %1 = arith.addi %0, %arg1 : i32
    %c0_i32 = arith.constant 0 : i32
    %2 = arith.minsi %1, %c0_i32 : i32
    %c0_i32_0 = arith.constant 0 : i32
    %c0_i32_1 = arith.constant 0 : i32
    return %2, %c0_i32_0 : i32, i32
  }
  func.func @transform_3(%arg0: i32, %arg1: i32) -> (i32, i32, i32) {
    %c0_i32 = arith.constant 0 : i32
    %c0_i32_0 = arith.constant 0 : i32
    %c0_i32_1 = arith.constant 0 : i32
    return %arg0, %c0_i32, %c0_i32_0 : i32, i32, i32
  }
}

</mosaic_0001>

<bundles_post_ra>
// kernel: tpu_custom_call.1
= control target key start
LH: loop header
LB: loop body
LE: loop exit
PB: predicated region body
PF: predicated region fallthrough
CT: control target
= control target key end

     0   :  { %vm111_vm0 = vcmask 130048   ;;  %s266_s0 = inlined_call_operand.vmem [shape: f32[8,16], index: 0, kind: input, shape index: {}]   ;;  %s267_s1 = inlined_call_operand.vmem [shape: s32[8,1], index: 1, kind: input, shape index: {}]   ;;  %s268_s2 = inlined_call_operand.vmem [shape: f32[8,1], index: 2, kind: input, shape index: {}]   ;;  %s269_s3 = inlined_call_operand.hbm [shape: f32[1,8,128], index: 3, kind: output, shape index: {}]  }
   0x1   :  { %v101_v0 = vld [vmem:[%s266_s0] sm:$0xff] }
   0x2   :  { %8 = vsyncpa [#allocation3], 0  ;;  %v112_v1 = vsel %vm111_vm0, %v101_v0, -inf  ;;  %v228_v2 = vmov 0   ;;  %v104_v3 = vld [vmem:[%s267_s1] sm:$0xff]  ;;  %v102_v7 = vlaneseq  ;;  %v229_v10 = vmov 0.0  }
   0x3   :  { %199 = vset.pattern.permute.xlu0 %v228_v2  ;;  %v136_v27 = vld [vmem:[%s268_s2] sm:$0xff]  ;;  %vm147_vm2 = vcmask 7168   ;;  %s230_s16 = smov [#allocation2]  }
   0x4   :  { %113 = vmax.xlane.f32.xlu0 %v112_v1  ;;  %v103_v8 = vand.u32 127, %v102_v7  ;;  %s167_s17 = sshll.u32 %s230_s16, 4  ;;  %s168_s17 = int_to_ptr.vmem [resolvable:$true] %s167_s17 }
   0x5   :  { %s206_s2 = scalar_lea.vmem %s168_s17, 128  ;;  %p211_p1 = scmp.lt.s32.totalorder %s168_s17, %s168_s17 }
   0x6   :  { %p207_p0 = scmp.ne.s32.totalorder %s168_s17, %s206_s2  ;;  %p212_p2 = scmp.lt.s32.totalorder %s206_s2, %s206_s2 }
   0x8   :  { %p213_p3 = por %p212_p2, %p211_p1 }
   0xa   :  { %p214_p4 = pnand %p213_p3, %p207_p0 }
  0x1a   :  { %106 = vperm.xlu0 %199, %v104_v3  }
  0x8d   :  { %v114_v4 = vpop.xlane.xlu0 %113 }
  0x8e   :  { %v115_v5 = vsub.f32 %v101_v0, %v114_v4 }
  0x90   :  { %v116_v6 = vmul.f32 1.442695, %v115_v5 }
  0x92   :  { %200 = vpow2.f32 %v116_v6 }
  0x95   :  { %v107_v9 = vpop.permute.xlu0 %106 }
  0x96   :  { %vm108_vm1 = vcmp.eq.s32.totalorder %v103_v8, %v107_v9 }
  0x97   :  { %v193_v11 = vsel %vm108_vm1, 1.0, %v229_v10 }
  0x98   :  { %v123_v14 = vmul.f32 %v193_v11, %v115_v5 }
  0x9a   :  { %v124_v15 = vsel %vm111_vm0, %v123_v14, 0.0 }
  0x9f   :  { %v201_v12 = vpop.eup %200 }
  0xa0   :  { %v118_v13 = vsel %vm111_vm0, %v201_v12, 0.0 }
  0xa1   :  { %119 = vadd.xlane.f32.xlu1 %v118_v13 }
  0xa5   :  { %125 = vadd.xlane.f32.xlu1 %v124_v15 }
 0x12a   :  { %v120_v16 = vpop.xlane.xlu1 %119 }
 0x12b   :  { %202 = vlog2.f32 %v120_v16 }
 0x12e   :  { %v126_v19 = vpop.xlane.xlu1 %125 }
 0x138   :  { %v203_v17 = vpop.eup %202 }
 0x139   :  { %v122_v18 = vmul.f32 0.6931472, %v203_v17 }
 0x13b   :  { %v127_v20 = vsub.f32 %v126_v19, %v122_v18 }
 0x13d   :  { %v128_v21 = vmul.f32 0.7, %v127_v20  ;;  %v134_v25 = vsub.f32 0.0, %v127_v20 }
 0x13f   :  { %v129_v22 = vmul.f32 1.442695, %v128_v21 }
 0x141   :  { %204 = vpow2.f32 %v129_v22 }
 0x14e   :  { %v205_v23 = vpop.eup %204 }
 0x14f   :  { %v131_v24 = vsub.f32 1.0, %v205_v23 }
 0x151   :  { %v133_v26 = vmul.f32 1.4285715, %v131_v24 }
 0x153   :  { %v135_v28 = vmul.f32 %v134_v25, %v133_v26 }
 0x155   :  { %v137_v29 = vmul.f32 %v136_v27, %v135_v28 }
 0x157   :  { %v148_v30 = vsel %vm147_vm2, %v137_v29, 0.0 }
 0x158   :  { %149 = vadd.xlane.f32.xlu1 %v148_v30 }
 0x1e1   :  { %v150_v31 = vpop.xlane.xlu1 %149 }
 0x1e2   :  { %v151_v32 = vrot.slane %v150_v31, 4 }
 0x1e4   :  { %v152_v33 = vadd.f32 %v151_v32, %v150_v31 }
 0x1e6   :  { %v153_v34 = vrot.slane %v152_v33, 2 }
 0x1e8   :  { %v154_v35 = vadd.f32 %v153_v34, %v152_v33 }
 0x1ea   :  { %v155_v36 = vrot.slane %v154_v35, 1 }
 0x1ec   :  { %v156_v37 = vadd.f32 %v155_v36, %v154_v35 }
 0x1ee   :  { %194 = vpush %v156_v37 }
 0x21f   :  { %s195_s18 = spop %194 }
 0x220   :  { %v158_v38 = vstv %s195_s18 }
 0x221   :  { %160 = vst [vmem:[#allocation2] sm:$0xff] %v158_v38 }
 0x222   :  { %217 = shalt.err (!%p214_p4)
}
 0x223   :  { %170 = dma.vmem_to_hbm [thread:$0]  %s168_s17, 128, %s269_s3, [#allocation3]  }
 0x224   :  { %226 = dma.done.wait [#allocation3], 128  }
 0x225   :  { %227 = vsyncadd [#allocation3], 4294967168 }
 0x226   :  { %174 = vsyncpa [#allocation3], 1 }

</bundles_post_ra>
